<compile_context>
chip_gen: v7x
topology: tpu7x:2x2x1
jax: 0.10.0
libtpu: 0.0.40
codegen_flags: <defaults>
</compile_context>

<pallas_src>
import functools

import jax
import jax.numpy as jnp
from jax.experimental import pallas as pl
from jax.experimental.pallas import tpu as pltpu


# ---------------------------------------------------------------------------
# Kernels
# ---------------------------------------------------------------------------
def _gh_infer_kernel(x_ref, w_ref, w2_ref, slab_ref):
    c = w_ref.shape[0]
    xf = x_ref[...].astype(jnp.float32)                 # (TB, D) f32 for norms
    d = xf.shape[-1]
    inv_d = jnp.float32(1.0 / d)

    # Cross term on the MXU; s = logits + ||x||^2/D (row-constant shift).
    xw = jax.lax.dot_general(x_ref[...], w_ref[...],
                             (((1,), (1,)), ((), ())),
                             preferred_element_type=jnp.float32)     # (TB, C)
    s = (2.0 * xw - w2_ref[...]) * inv_d                             # (TB, C)

    # Softmax / argmax are invariant to the per-row shift -> run them on s.
    m = jnp.max(s, axis=-1, keepdims=True)
    e = jnp.exp(s - m)
    denom = jnp.sum(e, axis=-1, keepdims=True)
    inv = 1.0 / denom                    # exp(0)=1 at the row max -> max score
    scores = e * inv

    # First-index argmax (torch semantics) reusing the row max m.
    cls = jax.lax.broadcasted_iota(jnp.int32, s.shape, 1)
    preds = jnp.min(jnp.where(s == m, cls, jnp.int32(c)),
                    axis=-1, keepdims=True)                          # (TB, 1)

    # x2 only needed because logits themselves are returned by the module.
    x2 = jnp.sum(xf * xf, axis=-1, keepdims=True)                    # (TB, 1)
    logits = s - x2 * inv_d

    # Lane-dense packed output: [logits | scores | pred | max_score | 0...].
    # Narrow static-slice stores into a zero-filled slab (no full-width iota /
    # nested-where temporaries).  preds round-trip via f32: exact for C < 2^24.
    slab_ref[...] = jnp.zeros_like(slab_ref)
    slab_ref[:, 0:c] = logits
    slab_ref[:, c:2 * c] = scores
    slab_ref[:, 2 * c:2 * c + 1] = preds.astype(jnp.float32)
    slab_ref[:, 2 * c + 1:2 * c + 2] = inv


def _gh_train_kernel(x_ref, w_ref, w2_ref, y_ref, cw_ref, part_ref, *,
                     batch, block_b):
    xf = x_ref[...].astype(jnp.float32)
    d = xf.shape[-1]
    inv_d = jnp.float32(1.0 / d)

    xw = jax.lax.dot_general(x_ref[...], w_ref[...],
                             (((1,), (1,)), ((), ())),
                             preferred_element_type=jnp.float32)     # (TB, C)
    # The -||x||^2/D shift cancels in  lse(logits) - logits[y]; skip it.
    s = (2.0 * xw - w2_ref[...]) * inv_d

    m = jnp.max(s, axis=-1, keepdims=True)
    denom = jnp.sum(jnp.exp(s - m), axis=-1, keepdims=True)
    lse = m + jnp.log(denom)                                         # (TB, 1)

    cls = jax.lax.broadcasted_iota(jnp.int32, s.shape, 1)
    onehot = cls == y_ref[...]                                       # (TB, C)
    picked = jnp.sum(jnp.where(onehot, s, 0.0), axis=-1, keepdims=True)
    wy = jnp.sum(jnp.where(onehot, cw_ref[...], 0.0), axis=-1, keepdims=True)
    nll = lse - picked

    # Mask padded rows (padded X rows are zero, so sum(x^2) is already clean).
    row = (jax.lax.broadcasted_iota(jnp.int32, nll.shape, 0)
           + pl.program_id(0) * block_b)
    wy = wy * (row < batch).astype(jnp.float32)

    # Per-tile partial sums only -> the training path is essentially read-only
    # on HBM (one tiny dense block per tile instead of 512 B per row).
    sum_wnll = jnp.sum(wy * nll)
    sum_wy = jnp.sum(wy)
    sum_x2 = jnp.sum(xf * xf)

    lane = jax.lax.broadcasted_iota(jnp.int32, part_ref.shape, 2)
    part_ref[...] = jnp.where(lane == 0, sum_wnll,
                    jnp.where(lane == 1, sum_wy,
                    jnp.where(lane == 2, sum_x2, 0.0)))


# ---------------------------------------------------------------------------
# Tiling / VMEM helpers
# ---------------------------------------------------------------------------
def _round_up(n, m):
    return ((n + m - 1) // m) * m


def _vmem_capacity_bytes():
    try:
        return int(pltpu.get_tpu_info().vmem_capacity_bytes)
    except Exception:
        return 128 * 1024 * 1024


def _num_tensorcores():
    try:
        info = pltpu.get_tpu_info()
        for name in ("num_cores", "num_tensorcores", "tensorcores_per_chip",
                     "cores_per_chip", "core_count"):
            v = getattr(info, name, None)
            if v:
                return int(v)
    except Exception:
        pass
    try:
        if "v7" in jax.devices()[0].device_kind.lower():
            return 2
    except Exception:
        pass
    return 1


def _choose_tb(b, d, out_lanes, itemsize, n_cores):
    """Batch tile from the actual per-row footprint (double-buffered X tile +
    double-buffered packed output) against half of VMEM, capped at 1024 rows.
    The >=2-grid-step split is only applied on multi-TensorCore chips (v7x)."""
    budget = _vmem_capacity_bytes() // 2
    per_row = 2 * d * itemsize + 2 * out_lanes * 4 + 8
    tb_mem = max(8, (budget // per_row) // 8 * 8)
    rb = _round_up(max(b, 1), 8)
    tb = min(1024, tb_mem, rb)
    if n_cores > 1 and rb > 8 and tb >= rb:
        tb = _round_up(-(-rb // n_cores), 8)
    return max(min(tb, rb), 8)


def _vmem_limit_bytes(tb, d, c, out_lanes, itemsize):
    est = 2 * tb * d * itemsize                       # X tile, double-buffered
    est += c * d * itemsize + 128 * 4                 # resident W + ||w||^2
    est += 2 * tb * max(out_lanes, 128) * 4           # packed output (2 bufs)
    est += 2 * tb * 4 + 128 * 4                       # targets + class weights
    limit = est + max(est // 2, 16 << 20)             # headroom, no double-count
    return int(min(max(limit, 32 << 20), _vmem_capacity_bytes()))


# ---------------------------------------------------------------------------
# pallas_call wrappers
# ---------------------------------------------------------------------------
def _run_infer(x, w, w2, tb, sw):
    bp, d = x.shape
    c = w.shape[0]
    return pl.pallas_call(
        _gh_infer_kernel,
        out_shape=jax.ShapeDtypeStruct((bp, sw), jnp.float32),
        grid=(bp // tb,),
        in_specs=[
            pl.BlockSpec((tb, d), lambda i: (i, 0)),          # X tile
            pl.BlockSpec((c, d), lambda i: (0, 0)),           # W (resident)
            pl.BlockSpec((1, c), lambda i: (0, 0)),           # ||w||^2 (resident)
        ],
        out_specs=pl.BlockSpec((tb, sw), lambda i: (i, 0)),   # packed slab
        compiler_params=pltpu.CompilerParams(
            dimension_semantics=("parallel",),
            vmem_limit_bytes=_vmem_limit_bytes(tb, d, c, sw, x.dtype.itemsize)),
    )(x, w, w2)


def _run_train(x, w, w2, y2d, cw, tb, batch):
    bp, d = x.shape
    c = w.shape[0]
    nt = bp // tb
    kernel = functools.partial(_gh_train_kernel, batch=batch, block_b=tb)
    return pl.pallas_call(
        kernel,
        out_shape=jax.ShapeDtypeStruct((nt, 8, 128), jnp.float32),
        grid=(nt,),
        in_specs=[
            pl.BlockSpec((tb, d), lambda i: (i, 0)),          # X tile
            pl.BlockSpec((c, d), lambda i: (0, 0)),           # W (resident)
            pl.BlockSpec((1, c), lambda i: (0, 0)),           # ||w||^2 (resident)
            pl.BlockSpec((tb, 1), lambda i: (i, 0)),          # targets
            pl.BlockSpec((1, c), lambda i: (0, 0)),           # class weights
        ],
        out_specs=pl.BlockSpec((1, 8, 128), lambda i: (i, 0, 0)),   # partials
        compiler_params=pltpu.CompilerParams(
            dimension_semantics=("parallel",),
            vmem_limit_bytes=_vmem_limit_bytes(tb, d, c, 0, x.dtype.itemsize)),
    )(x, w, w2, y2d, cw)


# ---------------------------------------------------------------------------
# Forward
# ---------------------------------------------------------------------------
@functools.partial(jax.jit,
                   static_argnames=("regularize", "has_y", "matmul_dtype"))
def _forward_jit(x, w, y, cls_w, regularize, has_y, matmul_dtype):
    b, d = x.shape
    c = w.shape[0]

    mm_dtype = jnp.dtype(matmul_dtype)
    xm = x.astype(mm_dtype)
    wm = w.astype(mm_dtype)
    # ||w_c||^2 hoisted out of the kernel (computed once, not per grid step).
    w2 = jnp.sum(wm.astype(jnp.float32) ** 2, axis=-1)[None, :]       # (1, C)

    n_cores = _num_tensorcores()
    sw = _round_up(2 * c + 2, 128)       # lane-dense packed slab width
    tb = _choose_tb(b, d, sw if not has_y else 0, xm.dtype.itemsize, n_cores)
    bp = _round_up(b, tb)
    if bp != b:                          # pad the batch to a tile multiple
        xm = jnp.pad(xm, ((0, bp - b), (0, 0)))

    if not has_y:
        slab = _run_infer(xm, wm, w2, tb, sw)[:b]
        logits = slab[:, :c]
        scores = slab[:, c:2 * c]
        preds = slab[:, 2 * c].astype(jnp.int32)
        max_scores = slab[:, 2 * c + 1]
        # torch: (X, scores, preds, scores.gather(-1, preds[..., None]).squeeze())
        return logits, scores, preds, max_scores

    y2d = y.astype(jnp.int32)[:, None]
    if bp != b:
        y2d = jnp.pad(y2d, ((0, bp - b), (0, 0)))
    cw = cls_w.astype(jnp.float32)[None, :]                           # (1, C)
    parts = _run_train(xm, wm, w2, y2d, cw, tb, b)                    # (nt,8,128)
    sum_wnll = jnp.sum(parts[:, 0, 0])
    sum_wy = jnp.sum(parts[:, 0, 1])
    sum_x2 = jnp.sum(parts[:, 0, 2])
    ce = sum_wnll / sum_wy                # == mean(nll) when weights are 1
    avg_dist = sum_x2 / jnp.float32(b * d)
    return ce + jnp.float32(regularize) * avg_dist


def gaussian_head_forward(x, w, y=None, weights=None, regularize=0.1,
                          matmul_dtype="float32"):
    """Mirrors GaussianHead.forward: inference tuple if y is None, scalar loss otherwise."""
    has_y = y is not None
    y_arg = y if has_y else jnp.zeros((x.shape[0],), jnp.int32)
    w_arg = weights if weights is not None else jnp.ones((w.shape[0],), jnp.float32)
    return _forward_jit(x, w, y_arg, w_arg, float(regularize), has_y,
                        str(matmul_dtype))


# ---------------------------------------------------------------------------
# Demo / self-test
# ---------------------------------------------------------------------------
if __name__ == "__main__":
    # GaussianHead(input_size=32, num_classes=16), batch=8
    input_size, num_classes, batch = 32, 16, 8
    key = jax.random.PRNGKey(0)
    k_w, k_x, k_y = jax.random.split(key, 3)

    # torch.rand(C, D) * 2 - 1  ->  uniform(-1, 1)
    W = jax.random.uniform(k_w, (num_classes, input_size),
                           dtype=jnp.float32, minval=-1.0, maxval=1.0)
    X = jax.random.normal(k_x, (batch, input_size), dtype=jnp.float32)
    y = jax.random.randint(k_y, (batch,), 0, num_classes, dtype=jnp.int32)

    ref_logits = -jnp.mean((X[:, None, :] - W[None, ...]) ** 2, axis=-1)
    ref_scores = jax.nn.softmax(ref_logits, axis=-1)

    # inference path (y=None): (logits, scores, preds, max_scores)
    logits, scores, preds, max_scores = gaussian_head_forward(X, W)
    jax.block_until_ready((logits, scores, preds, max_scores))
    assert logits.shape == (batch, num_classes)
    assert scores.shape == (batch, num_classes)
    assert preds.shape == (batch,)
    assert max_scores.shape == (batch,)
    assert jnp.allclose(logits, ref_logits, atol=1e-4, rtol=1e-4)
    assert jnp.allclose(scores, ref_scores, atol=1e-5)
    assert jnp.all(preds == jnp.argmax(ref_logits, axis=-1))
    assert jnp.allclose(max_scores, jnp.max(ref_scores, axis=-1), atol=1e-5)

    # ragged batch (not a multiple of the tile): exercises padding + slicing
    Xr = jax.random.normal(jax.random.PRNGKey(1), (13, input_size), jnp.float32)
    lr, sr, pr, mr = gaussian_head_forward(Xr, W)
    jax.block_until_ready((lr, sr, pr, mr))
    ref_lr = -jnp.mean((Xr[:, None, :] - W[None, ...]) ** 2, axis=-1)
    assert lr.shape == (13, num_classes) and pr.shape == (13,)
    assert jnp.allclose(lr, ref_lr, atol=1e-4, rtol=1e-4)
    assert jnp.all(pr == jnp.argmax(ref_lr, axis=-1))

    # training path: scalar loss = cross_entropy + regularize * mean(X**2)
    loss = gaussian_head_forward(X, W, y=y, regularize=0.1)
    jax.block_until_ready(loss)
    lse = jax.nn.logsumexp(ref_logits, axis=-1)
    nll = lse - ref_logits[jnp.arange(batch), y]
    ref_loss = jnp.mean(nll) + 0.1 * jnp.mean(X ** 2)
    assert jnp.allclose(loss, ref_loss, atol=1e-4, rtol=1e-4)

    # weighted training path
    cls_w = jnp.linspace(0.5, 1.5, num_classes, dtype=jnp.float32)
    loss_w = gaussian_head_forward(X, W, y=y, weights=cls_w, regularize=0.1)
    jax.block_until_ready(loss_w)
    wy = cls_w[y]
    ref_loss_w = jnp.sum(wy * nll) / jnp.sum(wy) + 0.1 * jnp.mean(X ** 2)
    assert jnp.allclose(loss_w, ref_loss_w, atol=1e-4, rtol=1e-4)

    # bf16 MXU path (fast path for v6e/v7x); norm/softmax math stays in f32
    lb, sb, pb, mb = gaussian_head_forward(X, W, matmul_dtype="bfloat16")
    jax.block_until_ready((lb, sb, pb, mb))
    assert lb.shape == (batch, num_classes)
    assert jnp.allclose(lb, ref_logits, atol=1e-1)

    print("KERNEL_OK")
</pallas_src>

<mosaic_0001>
module attributes {stable_mosaic.version = 11 : i64} {
  func.func @_gh_infer_kernel(%arg0: i32, %arg1: memref<8x32xf32, #tpu.memory_space<vmem>>, %arg2: memref<16x32xf32, #tpu.memory_space<vmem>>, %arg3: memref<1x16xf32, #tpu.memory_space<vmem>>, %arg4: memref<8x128xf32, #tpu.memory_space<vmem>>) attributes {dimension_semantics = [#tpu.dimension_semantics<parallel>], iteration_bounds = array<i64: 1>, scalar_prefetch = 0 : i64, scratch_operands = 0 : i64, tpu.core_type = #tpu.core_type<tc>, window_params = [{transform_indices = @transform_0, window_bounds = array<i64: 8, 32>}, {pipeline_mode = #tpu.pipeline_mode<synchronous>, transform_indices = @transform_1, window_bounds = array<i64: 16, 32>}, {pipeline_mode = #tpu.pipeline_mode<synchronous>, transform_indices = @transform_2, window_bounds = array<i64: 1, 16>}, {transform_indices = @transform_3, window_bounds = array<i64: 8, 128>}]} {
    %c0 = arith.constant 0 : index
    %c0_0 = arith.constant 0 : index
    %0 = vector.load %arg1[%c0, %c0_0] : memref<8x32xf32, #tpu.memory_space<vmem>>, vector<8x32xf32>
    %c0_1 = arith.constant 0 : index
    %c0_2 = arith.constant 0 : index
    %1 = vector.load %arg1[%c0_1, %c0_2] : memref<8x32xf32, #tpu.memory_space<vmem>>, vector<8x32xf32>
    %c0_3 = arith.constant 0 : index
    %c0_4 = arith.constant 0 : index
    %2 = vector.load %arg2[%c0_3, %c0_4] : memref<16x32xf32, #tpu.memory_space<vmem>>, vector<16x32xf32>
    %cst = arith.constant dense<0.000000e+00> : vector<8x16xf32>
    %3 = tpu.matmul %1, %2, %cst {dimension_numbers = #tpu.dot_dimension_numbers<[1], [1], [0], [0], [0, 0, 1, 0], [], []>} : vector<8x32xf32>, vector<16x32xf32>, vector<8x16xf32> -> vector<8x16xf32>
    %cst_5 = arith.constant 2.000000e+00 : f32
    %4 = vector.broadcast %cst_5 : f32 to vector<8x16xf32>
    %5 = arith.mulf %4, %3 : vector<8x16xf32>
    %c0_6 = arith.constant 0 : index
    %c0_7 = arith.constant 0 : index
    %6 = vector.load %arg3[%c0_6, %c0_7] : memref<1x16xf32, #tpu.memory_space<vmem>>, vector<1x16xf32>
    %7 = vector.broadcast %6 : vector<1x16xf32> to vector<8x16xf32>
    %8 = arith.subf %5, %7 : vector<8x16xf32>
    %cst_8 = arith.constant 3.125000e-02 : f32
    %9 = vector.broadcast %cst_8 : f32 to vector<8x16xf32>
    %10 = arith.mulf %8, %9 : vector<8x16xf32>
    %cst_9 = arith.constant dense<0xFF800000> : vector<8xf32>
    %11 = vector.multi_reduction <maximumf>, %10, %cst_9 [1] : vector<8x16xf32> to vector<8xf32>
    %12 = vector.shape_cast %11 : vector<8xf32> to vector<8x1xf32>
    %13 = vector.broadcast %12 : vector<8x1xf32> to vector<8x16xf32>
    %14 = arith.subf %10, %13 : vector<8x16xf32>
    %15 = math.exp %14 : vector<8x16xf32>
    %cst_10 = arith.constant dense<0.000000e+00> : vector<8xf32>
    %16 = vector.multi_reduction <add>, %15, %cst_10 [1] : vector<8x16xf32> to vector<8xf32>
    %17 = vector.shape_cast %16 : vector<8xf32> to vector<8x1xf32>
    %cst_11 = arith.constant 1.000000e+00 : f32
    %18 = vector.broadcast %cst_11 : f32 to vector<8x1xf32>
    %19 = arith.divf %18, %17 : vector<8x1xf32>
    %20 = vector.broadcast %19 : vector<8x1xf32> to vector<8x16xf32>
    %21 = arith.mulf %15, %20 : vector<8x16xf32>
    %22 = tpu.iota {dimensions = array<i32: 1>} : vector<8x16xi32>
    %23 = vector.broadcast %12 : vector<8x1xf32> to vector<8x16xf32>
    %24 = arith.cmpf oeq, %10, %23 : vector<8x16xf32>
    %c16_i32 = arith.constant 16 : i32
    %25 = vector.broadcast %c16_i32 : i32 to vector<8x16xi32>
    %26 = arith.select %24, %22, %25 : vector<8x16xi1>, vector<8x16xi32>
    %cst_12 = arith.constant dense<2147483647> : vector<8xi32>
    %27 = vector.multi_reduction <minsi>, %26, %cst_12 [1] : vector<8x16xi32> to vector<8xi32>
    %28 = vector.shape_cast %27 : vector<8xi32> to vector<8x1xi32>
    %29 = arith.mulf %0, %0 : vector<8x32xf32>
    %cst_13 = arith.constant dense<0.000000e+00> : vector<8xf32>
    %30 = vector.multi_reduction <add>, %29, %cst_13 [1] : vector<8x32xf32> to vector<8xf32>
    %31 = vector.shape_cast %30 : vector<8xf32> to vector<8x1xf32>
    %cst_14 = arith.constant 3.125000e-02 : f32
    %32 = vector.broadcast %cst_14 : f32 to vector<8x1xf32>
    %33 = arith.mulf %31, %32 : vector<8x1xf32>
    %34 = vector.broadcast %33 : vector<8x1xf32> to vector<8x16xf32>
    %35 = arith.subf %10, %34 : vector<8x16xf32>
    %cst_15 = arith.constant 0.000000e+00 : f32
    %36 = vector.broadcast %cst_15 : f32 to vector<8x128xf32>
    %c0_16 = arith.constant 0 : index
    %c0_17 = arith.constant 0 : index
    %37 = vector.load %arg4[%c0_16, %c0_17] : memref<8x128xf32, #tpu.memory_space<vmem>>, vector<8x128xf32>
    tpu.vector_store %arg4[%c0_16, %c0_17], %36 {strides = array<i32>} : memref<8x128xf32, #tpu.memory_space<vmem>>, vector<8x128xf32>,
    %c0_18 = arith.constant 0 : index
    %c0_19 = arith.constant 0 : index
    %38 = vector.load %arg4[%c0_18, %c0_19] : memref<8x128xf32, #tpu.memory_space<vmem>>, vector<8x16xf32>
    tpu.vector_store %arg4[%c0_18, %c0_19], %35 {strides = array<i32>} : memref<8x128xf32, #tpu.memory_space<vmem>>, vector<8x16xf32>,
    %c0_20 = arith.constant 0 : index
    %c16 = arith.constant 16 : index
    %39 = vector.load %arg4[%c0_20, %c16] : memref<8x128xf32, #tpu.memory_space<vmem>>, vector<8x16xf32>
    tpu.vector_store %arg4[%c0_20, %c16], %21 {strides = array<i32>} : memref<8x128xf32, #tpu.memory_space<vmem>>, vector<8x16xf32>,
    %40 = arith.sitofp %28 : vector<8x1xi32> to vector<8x1xf32>
    %c0_21 = arith.constant 0 : index
    %c32 = arith.constant 32 : index
    %41 = vector.load %arg4[%c0_21, %c32] : memref<8x128xf32, #tpu.memory_space<vmem>>, vector<8x1xf32>
    tpu.vector_store %arg4[%c0_21, %c32], %40 {strides = array<i32>} : memref<8x128xf32, #tpu.memory_space<vmem>>, vector<8x1xf32>,
    %c0_22 = arith.constant 0 : index
    %c33 = arith.constant 33 : index
    %42 = vector.load %arg4[%c0_22, %c33] : memref<8x128xf32, #tpu.memory_space<vmem>>, vector<8x1xf32>
    tpu.vector_store %arg4[%c0_22, %c33], %19 {strides = array<i32>} : memref<8x128xf32, #tpu.memory_space<vmem>>, vector<8x1xf32>,
    return
  }
  func.func @transform_0(%arg0: i32) -> (i32, i32) {
    %c0_i32 = arith.constant 0 : i32
    %c0_i32_0 = arith.constant 0 : i32
    return %arg0, %c0_i32 : i32, i32
  }
  func.func @transform_1(%arg0: i32) -> (i32, i32) {
    %c0_i32 = arith.constant 0 : i32
    %c0_i32_0 = arith.constant 0 : i32
    %c0_i32_1 = arith.constant 0 : i32
    return %c0_i32, %c0_i32_0 : i32, i32
  }
  func.func @transform_2(%arg0: i32) -> (i32, i32) {
    %c0_i32 = arith.constant 0 : i32
    %c0_i32_0 = arith.constant 0 : i32
    %c0_i32_1 = arith.constant 0 : i32
    return %c0_i32, %c0_i32_0 : i32, i32
  }
  func.func @transform_3(%arg0: i32) -> (i32, i32) {
    %c0_i32 = arith.constant 0 : i32
    %c0_i32_0 = arith.constant 0 : i32
    return %arg0, %c0_i32 : i32, i32
  }
}

</mosaic_0001>

<bundles_post_ra>
// kernel: _forward_jit.1
= control target key start
LH: loop header
LB: loop body
LE: loop exit
PB: predicated region body
PF: predicated region fallthrough
CT: control target
= control target key end

     0   :  { %vm17_vm0 = vcmask 261120   ;;  %v188_v0 = vmov 0.0|0.0   ;;  %vm189_vm2 = vmmov 0   ;;  %v190_v3 = vmov 0.0   ;;  %s191_s21 = smov 16   ;;  %s247_s1 = inlined_call_operand.vmem [shape: f32[16,32], index: 1, kind: input, shape index: {}]   ;;  %s248_s3 = inlined_call_operand.vmem [shape: f32[8,128], index: 3, kind: output, shape index: {}]   ;;  %s249_s0 = inlined_call_operand.vmem [shape: f32[8,32], index: 0, kind: input, shape index: {}]   ;;  %s250_s2 = inlined_call_operand.vmem [shape: f32[1,16], index: 2, kind: input, shape index: {}]  }
   0x1   :  { %176 = vmatprep.subr.bf16.mxu0 %v188_v0  ;;  %v15_v1 = vld [vmem:[%s247_s1] sm:$0xff]  ;;  %v16_v2 = vld [vmem:[%s247_s1 + $0x8] sm:$0xff]  ;;  %vm178_vm1 = vmpackc.low %vm17_vm0, %vm17_vm0  ;;  %173 = vmatprep.mubr.msk.f32.mxu0 %vm189_vm2, %v190_v3  ;;  %145 = vst [vmem:[%s248_s3] sm:$0xff] %v190_v3  ;;  %vm107_vm3 = vcmask 130048   ;;  %v120_v13 = vlaneseq  ;;  %vm151_vm6 = vcmask 261248   ;;  %vm154_vm7 = vcmask 269568  }
   0x2   :  { %v177_v4 = vpack.c.bf16 %v16_v2, %v15_v1  ;;  %v14_v5 = vld [vmem:[%s249_s0] sm:$0xff]  ;;  %vm156_vm8 = vcmask 277768  }
   0x3   :  { %v165_v7 = vld [vmem:[%s250_s2] ss:$0 sm:$0xff]  ;;  %v121_v14 = vand.u32 127, %v120_v13  ;;  %v139_v21 = vmul.f32 %v14_v5, %v14_v5 }
   0x4   :  { %179 = vmatpush3.bf16.xpose.msk.msra.mxu0 %vm178_vm1, %v177_v4 }
   0x5   :  { %v140_v23 = vsel %vm17_vm0, %v139_v21, 0.0 }
   0xb   :  { %174 = vmatmul.mubr.msk.f32.vlgmr.msra.gmra.mrb[0].mxu0 %vm17_vm0, %v14_v5 }
  0xde   :  { %v93_v6 = vpop.f32.mrb[0].mxu0 }
  0xdf   :  { %v97_v8 = vmul.f32 2.0, %v93_v6  ;;  %v175_v9 = vpop.f32.mrb[1].mxu0 }
  0xe1   :  { %v105_v10 = vsub.f32 %v97_v8, %v165_v7 }
  0xe3   :  { %v106_v11 = vmul.f32 0.03125, %v105_v10 }
  0xe5   :  { %v108_v12 = vsel %vm107_vm3, %v106_v11, -inf }
  0xe6   :  { %109 = vmax.xlane.f32.xlu0 %v108_v12 }
 0x173   :  { %v110_v15 = vpop.xlane.xlu0 %109 }
 0x174   :  { %v111_v16 = vsub.f32 %v106_v11, %v110_v15  ;;  %vm122_vm4 = vcmp.eq.f32.partialorder %v106_v11, %v110_v15 }
 0x175   :  { %v123_v17 = vsel %vm122_vm4, %v121_v14, 16 }
 0x176   :  { %v112_v18 = vmul.f32 1.442695, %v111_v16  ;;  %v124_v19 = vsel %vm107_vm3, %v123_v17, 2147483647 }
 0x177   :  { %v126_v20 = vshra.s32 %v124_v19, 16  ;;  %v125_v26 = vand.u32 65535, %v124_v19 }
 0x178   :  { %184 = vpow2.f32 %v112_v18 }
 0x179   :  { %v128_v22 = vcvt.s32.f32 %v126_v20  ;;  %v127_v28 = vcvt.s32.f32 %v125_v26 }
 0x17b   :  { %129 = vmin.xlane.f32.xlu0 %v128_v22 }
 0x17f   :  { %141 = vadd.xlane.f32.xlu0 %v140_v23 }
 0x182   :  { %v185_v24 = vpop.eup %184 }
 0x183   :  { %v114_v25 = vsel %vm107_vm3, %v185_v24, 0.0 }
 0x184   :  { %115 = vadd.xlane.f32.xlu1 %v114_v25 }
 0x208   :  { %v130_v27 = vpop.xlane.xlu0 %129 }
 0x209   :  { %vm131_vm5 = vcmp.eq.f32.partialorder %v128_v22, %v130_v27  ;;  %v136_v36 = vcvt.f32.s32 %v130_v27 }
 0x20a   :  { %v132_v29 = vsel %vm131_vm5, %v127_v28, inf }
 0x20b   :  { %133 = vmin.xlane.f32.xlu1 %v132_v29  ;;  %v137_v38 = vshll.u32 %v136_v36, 16 }
 0x20c   :  { %v142_v30 = vpop.xlane.xlu0 %141 }
 0x20d   :  { %v143_v31 = vmul.f32 0.03125, %v142_v30 }
 0x20f   :  { %v144_v32 = vsub.f32 %v106_v11, %v143_v31 }
 0x211   :  { %146 = vst.msk [vmem:[%s248_s3] sm:$0xff] %vm107_vm3, %v144_v32  ;;  %v116_v33 = vpop.xlane.xlu1 %115 }
 0x212   :  { %186 = vrcp.f32 %v116_v33 }
 0x21c   :  { %v187_v34 = vpop.eup %186 }
 0x21d   :  { %v119_v35 = vmul.f32 %v187_v34, %v185_v24 }
 0x21f   :  { %148 = vrot.lane.b32.xlu1 %v119_v35, %s191_s21 }
 0x298   :  { %v134_v37 = vpop.xlane.xlu1 %133 }
 0x299   :  { %v135_v39 = vcvt.f32.s32 %v134_v37 }
 0x29b   :  { %v138_v40 = vadd.s32 %v137_v38, %v135_v39 }
 0x29c   :  { %v149_v41 = vpop.permute.xlu1 %148 }
 0x29d   :  { %v153_v42 = vcvt.s32.f32 %v138_v40  ;;  %152 = vst.msk [vmem:[%s248_s3] sm:$0xff] %vm151_vm6, %v149_v41 }
 0x29f   :  { %155 = vst.msk [vmem:[%s248_s3] sm:$0xff] %vm154_vm7, %v153_v42 }
 0x2a0   :  { %157 = vst.msk [vmem:[%s248_s3] sm:$0xff] %vm156_vm8, %v187_v34 }

</bundles_post_ra>
